<compile_context>
chip_gen: v6e
topology: v6e:2x2x1
jax: 0.10.0
libtpu: 0.0.40
codegen_flags: <defaults>
</compile_context>

<pallas_src>
import jax
import jax.numpy as jnp
from jax import lax
from jax.experimental import pallas as pl
from jax.experimental.pallas import tpu as pltpu

LANES = 128
MIB = 1024 * 1024


def _round_up(a, b):
    return ((a + b - 1) // b) * b


def _sublane_granule(dtype):
    # Native sublane packing: 8 rows for 4-byte, 16 for 2-byte, 32 for 1-byte dtypes.
    return max(8, 32 // jnp.dtype(dtype).itemsize)


def _device_kind():
    try:
        return jax.devices()[0].device_kind.lower()
    except Exception:
        return ""


def _vmem_capacity_bytes():
    try:
        return int(pltpu.get_tpu_info().vmem_capacity_bytes)
    except Exception:
        return 64 * MIB  # conservative fallback: assume v7x-sized VMEM


def _num_core_splits():
    # Only v7x has 2 TensorCores per chip. On 1-TC chips (v5e/v6e) a core-split
    # axis is just a serial loop that can re-DMA a fully-masked duplicate tile,
    # so keep it at 1 there.
    kind = _device_kind()
    if "v7" in kind or "tpu7" in kind or "7x" in kind:
        return 2
    return 1


def _acc_rows(tile_rows):
    # Wider resident accumulator block -> several independent accumulator vregs
    # of ILP on the per-tile reduce instead of one long dependent add chain.
    for r in (32, 16, 8):
        if tile_rows % r == 0:
            return r
    return 8


def _make_sse_kernel(tile_rows, acc_rows, steps_per_core, rows_valid, need_mask):
    groups = tile_rows // acc_rows

    def _reduce(sq):
        # Sublane-group reduce into the resident (acc_rows, 128) block; pure
        # VPU vreg adds, no cross-lane work per step.
        return jnp.sum(sq.reshape(groups, acc_rows, LANES), axis=0)

    def kernel(x_ref, y_ref, o_ref):
        c = pl.program_id(0)   # core-split index
        i = pl.program_id(1)   # reduction step within this core's range

        @pl.when(i == 0)
        def _():
            o_ref[...] = jnp.zeros_like(o_ref)

        x = x_ref[...].astype(jnp.float32)
        y = y_ref[...].astype(jnp.float32)
        d = x - y
        sq = d * d

        if not need_mask:
            # Every tile is a full, valid block: single unmasked fast path.
            o_ref[...] += _reduce(sq)
        else:
            g = c * steps_per_core + i
            is_boundary = (g + 1) * tile_rows > rows_valid

            @pl.when(jnp.logical_not(is_boundary))
            def _():
                # Interior tiles stay mask-free (sub, mul, reduce only).
                o_ref[...] += _reduce(sq)

            @pl.when(is_boundary)
            def _():
                # Partial last tile (OOB rows hold unspecified data) or a
                # core's duplicated clamped tile: zero rows outside the slab.
                local_row = lax.broadcasted_iota(jnp.int32, sq.shape, 0)
                global_row = local_row + g * tile_rows
                o_ref[...] += _reduce(jnp.where(global_row < rows_valid, sq, 0.0))

    return kernel


def _flatten_to_slab(a):
    """Flatten `a` (native dtype) into a (rows, 128) slab plus a <128-elem tail.

    No jnp.pad (which would materialize a full HBM copy); 128-aligned element
    counts reshape for free.
    """
    flat = a.reshape(-1)
    n = flat.shape[0]
    main = (n // LANES) * LANES
    slab = flat[:main].reshape(-1, LANES)
    tail = flat[main:]
    return slab, tail, n


def mse_loss_func(inp, target):
    """Pallas implementation of MSELossFunc.forward: mean((x - y)^2) * 97."""
    assert inp.shape == target.shape, "input/target shape mismatch"

    x_slab, x_tail, n = _flatten_to_slab(inp)
    y_slab, y_tail, _ = _flatten_to_slab(target)
    rows = x_slab.shape[0]

    # Tail (< 128 leftover elements) is negligible work; summing it in plain
    # JAX keeps the kernel slab path pad-free for unaligned sizes.
    tail_sse = jnp.sum(
        jnp.square(x_tail.astype(jnp.float32) - y_tail.astype(jnp.float32)),
        dtype=jnp.float32,
    )

    if rows == 0:
        # Entire input fits in the tail (n < 128): nothing for the kernel to do.
        return (tail_sse / jnp.float32(n)) * jnp.float32(97.0)

    itemsize = max(jnp.dtype(x_slab.dtype).itemsize, jnp.dtype(y_slab.dtype).itemsize)
    granule = max(_sublane_granule(x_slab.dtype), _sublane_granule(y_slab.dtype))

    # Per-generation tile / VMEM sizing: 2 inputs x 2 pipeline buffers x tile
    # must sit well under the scoped limit, which itself stays under physical
    # VMEM (64 MiB on v7x, 128 MiB on v5e/v6e).
    vmem_cap = _vmem_capacity_bytes()
    vmem_limit = min(vmem_cap * 3 // 4, 96 * MIB)
    tile_bytes = max(1 * MIB, min(8 * MIB, (vmem_limit - 4 * MIB) // 4))
    max_tile_rows = max(granule, (tile_bytes // (LANES * itemsize)) // granule * granule)

    tile_rows = min(max_tile_rows, _round_up(rows, granule))
    acc_rows = _acc_rows(tile_rows)

    num_splits = _num_core_splits()
    steps_total = (rows + tile_rows - 1) // tile_rows
    steps_per_core = (steps_total + num_splits - 1) // num_splits
    need_mask = (num_splits * steps_per_core * tile_rows) != rows

    if num_splits > 1:
        # Make the 2-TC split actually bind on v7x.
        dim_sems = (pltpu.CORE_PARALLEL, pltpu.ARBITRARY)
    else:
        dim_sems = ("arbitrary", "arbitrary")

    def in_map(c, i):
        # Clamp so a core's duplicated trailing step re-reads a valid block
        # (its contribution is fully masked to zero in-kernel).
        return (jnp.minimum(c * steps_per_core + i, steps_total - 1), 0)

    kernel = _make_sse_kernel(tile_rows, acc_rows, steps_per_core, rows, need_mask)

    bytes_accessed = rows * LANES * (
        jnp.dtype(x_slab.dtype).itemsize + jnp.dtype(y_slab.dtype).itemsize
    ) + num_splits * acc_rows * LANES * 4
    cost = pl.CostEstimate(
        flops=3 * rows * LANES, transcendentals=0, bytes_accessed=int(bytes_accessed)
    )

    partials = pl.pallas_call(
        kernel,
        out_shape=jax.ShapeDtypeStruct((num_splits * acc_rows, LANES), jnp.float32),
        grid_spec=pltpu.PrefetchScalarGridSpec(
            num_scalar_prefetch=0,
            grid=(num_splits, steps_per_core),
            in_specs=[
                pl.BlockSpec((tile_rows, LANES), in_map),
                pl.BlockSpec((tile_rows, LANES), in_map),
            ],
            out_specs=pl.BlockSpec((acc_rows, LANES), lambda c, i: (c, 0)),
        ),
        compiler_params=pltpu.CompilerParams(
            dimension_semantics=dim_sems,
            vmem_limit_bytes=int(vmem_limit),
        ),
        cost_estimate=cost,
    )(x_slab, y_slab)

    # Glue: single cross-lane reduce, mean over true element count, 97x scale.
    sse = jnp.sum(partials) + tail_sse
    return (sse / jnp.float32(n)) * jnp.float32(97.0)


if __name__ == "__main__":
    key = jax.random.PRNGKey(0)
    k1, k2 = jax.random.split(key)
    # Small shapes consistent with a typical NCHW tensor pair.
    x = jax.random.normal(k1, (2, 4, 16, 16), dtype=jnp.float32)
    y = jax.random.normal(k2, (2, 4, 16, 16), dtype=jnp.float32)

    loss = mse_loss_func(x, y)
    jax.block_until_ready(loss)

    # Reference check in plain JAX.
    ref = jnp.mean(jnp.square(x - y)) * 97.0
    assert jnp.allclose(loss, ref, rtol=1e-5, atol=1e-5), (loss, ref)

    print("KERNEL_OK")
</pallas_src>

<mosaic_0001>
module attributes {stable_mosaic.version = 11 : i64} {
  func.func @kernel(%arg0: i32, %arg1: i32, %arg2: memref<16x128xf32, #tpu.memory_space<vmem>>, %arg3: memref<16x128xf32, #tpu.memory_space<vmem>>, %arg4: memref<16x128xf32, #tpu.memory_space<vmem>>) attributes {dimension_semantics = [#tpu.dimension_semantics<arbitrary>, #tpu.dimension_semantics<arbitrary>], iteration_bounds = array<i64: 1, 1>, scalar_prefetch = 0 : i64, scratch_operands = 0 : i64, tpu.core_type = #tpu.core_type<tc>, window_params = [{transform_indices = @transform_0, window_bounds = array<i64: 16, 128>}, {transform_indices = @transform_1, window_bounds = array<i64: 16, 128>}, {transform_indices = @transform_2, window_bounds = array<i64: 16, 128>}]} {
    %c0_i32 = arith.constant 0 : i32
    %0 = arith.cmpi eq, %arg1, %c0_i32 : i32
    %1 = arith.extui %0 : i1 to i32
    %c0_i32_0 = arith.constant 0 : i32
    %2 = arith.cmpi ne, %1, %c0_i32_0 : i32
    scf.if %2 {
      %cst_8 = arith.constant 0.000000e+00 : f32
      %12 = vector.broadcast %cst_8 : f32 to vector<16x128xf32>
      %c0_9 = arith.constant 0 : index
      %c0_10 = arith.constant 0 : index
      %13 = vector.load %arg4[%c0_9, %c0_10] : memref<16x128xf32, #tpu.memory_space<vmem>>, vector<16x128xf32>
      tpu.vector_store %arg4[%c0_9, %c0_10], %12 {strides = array<i32>} : memref<16x128xf32, #tpu.memory_space<vmem>>, vector<16x128xf32>,
    } else {
    }
    %c0 = arith.constant 0 : index
    %c0_1 = arith.constant 0 : index
    %3 = vector.load %arg2[%c0, %c0_1] : memref<16x128xf32, #tpu.memory_space<vmem>>, vector<16x128xf32>
    %c0_2 = arith.constant 0 : index
    %c0_3 = arith.constant 0 : index
    %4 = vector.load %arg3[%c0_2, %c0_3] : memref<16x128xf32, #tpu.memory_space<vmem>>, vector<16x128xf32>
    %5 = arith.subf %3, %4 : vector<16x128xf32>
    %6 = arith.mulf %5, %5 : vector<16x128xf32>
    %c0_4 = arith.constant 0 : index
    %c0_5 = arith.constant 0 : index
    %7 = vector.load %arg4[%c0_4, %c0_5] : memref<16x128xf32, #tpu.memory_space<vmem>>, vector<16x128xf32>
    %8 = vector.shape_cast %6 : vector<16x128xf32> to vector<1x16x128xf32>
    %cst = arith.constant dense<0.000000e+00> : vector<16x128xf32>
    %9 = vector.multi_reduction <add>, %8, %cst [0] : vector<1x16x128xf32> to vector<16x128xf32>
    %10 = arith.addf %7, %9 : vector<16x128xf32>
    %c0_6 = arith.constant 0 : index
    %c0_7 = arith.constant 0 : index
    %11 = vector.load %arg4[%c0_6, %c0_7] : memref<16x128xf32, #tpu.memory_space<vmem>>, vector<16x128xf32>
    tpu.vector_store %arg4[%c0_6, %c0_7], %10 {strides = array<i32>} : memref<16x128xf32, #tpu.memory_space<vmem>>, vector<16x128xf32>,
    return
  }
  func.func @transform_0(%arg0: i32, %arg1: i32) -> (i32, i32) {
    %c1_i32 = arith.constant 1 : i32
    %0 = arith.muli %arg0, %c1_i32 : i32
    %1 = arith.addi %0, %arg1 : i32
    %c0_i32 = arith.constant 0 : i32
    %2 = arith.minsi %1, %c0_i32 : i32
    %c0_i32_0 = arith.constant 0 : i32
    %c0_i32_1 = arith.constant 0 : i32
    return %2, %c0_i32_0 : i32, i32
  }
  func.func @transform_1(%arg0: i32, %arg1: i32) -> (i32, i32) {
    %c1_i32 = arith.constant 1 : i32
    %0 = arith.muli %arg0, %c1_i32 : i32
    %1 = arith.addi %0, %arg1 : i32
    %c0_i32 = arith.constant 0 : i32
    %2 = arith.minsi %1, %c0_i32 : i32
    %c0_i32_0 = arith.constant 0 : i32
    %c0_i32_1 = arith.constant 0 : i32
    return %2, %c0_i32_0 : i32, i32
  }
  func.func @transform_2(%arg0: i32, %arg1: i32) -> (i32, i32) {
    %c0_i32 = arith.constant 0 : i32
    %c0_i32_0 = arith.constant 0 : i32
    return %arg0, %c0_i32 : i32, i32
  }
}

</mosaic_0001>

<bundles_post_ra>
// kernel: tpu_custom_call.1
= control target key start
LH: loop header
LB: loop body
LE: loop exit
PB: predicated region body
PF: predicated region fallthrough
CT: control target
= control target key end

     0   :  { %7 = vsyncpa [#allocation3], 0  ;;  %s214_s0 = inlined_call_operand.hbm [shape: f32[16,128], index: 0, kind: input, shape index: {}]   ;;  %s215_s1 = inlined_call_operand.hbm [shape: f32[16,128], index: 1, kind: input, shape index: {}]   ;;  %s216_s2 = inlined_call_operand.hbm [shape: f32[16,128], index: 2, kind: output, shape index: {}]  }
   0x1   :  { %8 = vsyncpa [#allocation6], 0 }
   0x2   :  { %9 = vsyncpa [#allocation4], 0  ;;  %s176_s9 = smov [#allocation2]  }
   0x3   :  { %s21_s10 = sshll.u32 %s176_s9, 4  ;;  %s22_s10 = int_to_ptr.vmem [resolvable:$true] %s21_s10 }
   0x4   :  { %s118_s11 = scalar_lea.vmem %s22_s10, 256  ;;  %p123_p1 = scmp.lt.s32.totalorder %s22_s10, %s22_s10 }
   0x5   :  { %p119_p0 = scmp.ne.s32.totalorder %s22_s10, %s118_s11  ;;  %p124_p2 = scmp.lt.s32.totalorder %s118_s11, %s118_s11 }
   0x7   :  { %p125_p3 = por %p124_p2, %p123_p1 }
   0x9   :  { %p126_p4 = pnand %p125_p3, %p119_p0 }
   0xb   :  { %129 = shalt.err (!%p126_p4)
}
   0xc   :  { %s177_s12 = smov 128   ;;  %s178_s13 = smov 8  }
   0xd   :  { %27 = dma.hbm_to_vmem [thread:$0]  %s214_s0, 256, %s22_s10, [#allocation3], %s177_s12, %s177_s12, %s178_s13  }
   0xe   :  { %s179_s16 = smov [#allocation5]  }
   0xf   :  { %s39_s17 = sshll.u32 %s179_s16, 4  ;;  %s40_s17 = int_to_ptr.vmem [resolvable:$true] %s39_s17 }
  0x10   :  { %s138_s18 = scalar_lea.vmem %s40_s17, 256  ;;  %p143_p6 = scmp.lt.s32.totalorder %s40_s17, %s40_s17 }
  0x11   :  { %p139_p5 = scmp.ne.s32.totalorder %s40_s17, %s138_s18  ;;  %p144_p7 = scmp.lt.s32.totalorder %s138_s18, %s138_s18 }
  0x13   :  { %p145_p8 = por %p144_p7, %p143_p6 }
  0x15   :  { %p146_p9 = pnand %p145_p8, %p139_p5 }
  0x17   :  { %149 = shalt.err (!%p146_p9)
}
  0x18   :  { %45 = dma.hbm_to_vmem [thread:$0]  %s215_s1, 256, %s40_s17, [#allocation6], %s177_s12, %s177_s12, %s178_s13  }
  0x19   :  { %170 = dma.done.wait [#allocation3], 256  }
  0x1a   :  { %171 = vsyncadd [#allocation3], 4294967040 }
  0x1b   :  { %172 = dma.done.wait [#allocation6], 256  }
  0x1c   :  { %173 = vsyncadd [#allocation6], 4294967040  ;;  %v66_v0 = vld [vmem:[#allocation2] sm:$0xff]  ;;  %v68_v1 = vld [vmem:[#allocation5] sm:$0xff]  ;;  %s180_s0 = smov [#allocation7]  }
  0x1d   :  { %v67_v2 = vld [vmem:[#allocation2 + $0x8] sm:$0xff]  ;;  %v70_v3 = vsub.f32 %v66_v0, %v68_v1  ;;  %v69_v4 = vld [vmem:[#allocation5 + $0x8] sm:$0xff]  ;;  %s87_s21 = sshll.u32 %s180_s0, 4  ;;  %s88_s21 = int_to_ptr.vmem [resolvable:$true] %s87_s21 }
  0x1e   :  { %v71_v5 = vsub.f32 %v67_v2, %v69_v4  ;;  %s150_s22 = scalar_lea.vmem %s88_s21, 256  ;;  %p155_p11 = scmp.lt.s32.totalorder %s88_s21, %s88_s21 }
  0x1f   :  { %v72_v6 = vmul.f32 %v70_v3, %v70_v3  ;;  %p151_p10 = scmp.ne.s32.totalorder %s88_s21, %s150_s22  ;;  %p156_p12 = scmp.lt.s32.totalorder %s150_s22, %s150_s22 }
  0x20   :  { %v73_v7 = vmul.f32 %v71_v5, %v71_v5 }
  0x21   :  { %80 = vst [vmem:[#allocation7] sm:$0xff] %v72_v6  ;;  %p157_p13 = por %p156_p12, %p155_p11 }
  0x22   :  { %81 = vst [vmem:[#allocation7 + $0x8] sm:$0xff] %v73_v7 }
  0x23   :  { %p158_p0 = pnand %p157_p13, %p151_p10 }
  0x25   :  { %161 = shalt.err (!%p158_p0)
}
  0x26   :  { %93 = dma.vmem_to_hbm [thread:$0]  %s88_s21, 256, %s216_s2, [#allocation4], %s177_s12, %s177_s12, %s178_s13  }
  0x27   :  { %174 = dma.done.wait [#allocation4], 256  }
  0x28   :  { %175 = vsyncadd [#allocation4], 4294967040 }
  0x29   :  { %97 = vsyncpa [#allocation3], 1 }
  0x2a   :  { %98 = vsyncpa [#allocation6], 1 }
  0x2b   :  { %99 = vsyncpa [#allocation4], 1 }

</bundles_post_ra>
